<compile_context>
chip_gen: v7x
topology: tpu7x:2x2x1
jax: 0.10.0
libtpu: 0.0.40
codegen_flags: <defaults>
</compile_context>

<pallas_src>
import functools

import jax
import jax.numpy as jnp
from jax.experimental import pallas as pl
from jax.experimental.pallas import tpu as pltpu


def _spatial_attention_kernel(x_ref, col_ref, row_ref, o_ref,
                              sum_acc, max_acc, *, ksize, n_channels):
    """Grid = (N, C // c_tile); channel tiles are the inner reduction axis.

    x_ref:   (c_tile, H, W)   one channel slab of one batch element (NCHW)
    col_ref: (k, 2W, W) bf16  banded column matrices, conv weights folded in,
                              avg-channel stacked over max-channel (K = 2W)
    row_ref: (H, k*H)   bf16  0/1 row-shift matrices stacked along columns
    o_ref:   (H, W)           output block (batch & channel dims squeezed)
    sum_acc, max_acc: (H, W) f32 VMEM scratch (persist across grid steps)
    """
    c_idx = pl.program_id(1)

    x = x_ref[...]                                         # native dtype
    # Max reduction stays in the input dtype (no slab upcast for bf16 inputs);
    # the sum upcasts only this bounded tile and accumulates in f32.
    part_max = jnp.max(x, axis=0).astype(jnp.float32)      # (H, W)
    part_sum = jnp.sum(x.astype(jnp.float32), axis=0)      # (H, W)

    @pl.when(c_idx == 0)
    def _init():
        sum_acc[...] = jnp.zeros_like(sum_acc)
        max_acc[...] = jnp.full_like(max_acc, -jnp.inf)

    sum_acc[...] = sum_acc[...] + part_sum
    max_acc[...] = jnp.maximum(max_acc[...], part_max)

    @pl.when(c_idx == pl.num_programs(1) - 1)
    def _finalize():
        # mean via constant multiply instead of a per-element divide.
        mean = sum_acc[...] * jnp.float32(1.0 / n_channels)
        # [mean | max] -> (H, 2W), cast once to bf16 for the MXU epilogue.
        pooled = jnp.concatenate([mean, max_acc[...]], axis=-1
                                 ).astype(jnp.bfloat16)
        # k column-shift matmuls, each with K = 2W (avg & max fused per dot).
        inners = [
            jnp.dot(pooled, col_ref[kh], preferred_element_type=jnp.float32)
            for kh in range(ksize)
        ]
        # Single row-shift matmul with K = k*H.
        inner_stk = jnp.concatenate(inners, axis=0).astype(jnp.bfloat16)
        logits = jnp.dot(row_ref[...], inner_stk,
                         preferred_element_type=jnp.float32)       # (H, W)
        # Numerically-stable sigmoid: exp + approx reciprocal (both EUP),
        # no inf intermediate for strongly negative logits.
        pos = logits >= 0.0
        e = jnp.exp(jnp.where(pos, -logits, logits))               # in (0, 1]
        inv = pl.reciprocal(1.0 + e, approx=True)
        o_ref[...] = jnp.where(pos, inv, e * inv).astype(o_ref.dtype)


def _build_shift_matrices(conv_w, H, W, dtype=jnp.bfloat16):
    """Fold the (1, 2, k, k) conv weight into banded shift matrices.

    Zero-padded cross-correlation
        out[h, w] = sum_{c, kh, kw} w[0, c, kh, kw] * pool_c[h+kh-p, w+kw-p]
    is rewritten as
        out = sum_kh R[kh] @ ( [mean | max] @ [[A_mean[kh]], [A_max[kh]]] )
    i.e. k matmuls with K = 2W plus one matmul with K = k*H.  Out-of-range
    taps vanish automatically (zero padding).  Row matrices are exact 0/1,
    column matrices only carry conv-weight rounding -> safe to store in bf16.
    """
    ksize = conv_w.shape[-1]
    pad = ksize // 2
    wmat = conv_w.reshape(2, ksize, ksize).astype(jnp.float32)     # [c, kh, kw]

    wr = jnp.arange(W)
    # shift_w[kw][w', w] = 1 iff w' == w + kw - pad
    shift_w = jnp.stack(
        [(wr[:, None] == wr[None, :] + (kw - pad)).astype(jnp.float32)
         for kw in range(ksize)], axis=0)                          # (k, W, W)
    # col[c, kh] = sum_kw wmat[c, kh, kw] * shift_w[kw]
    col = jnp.einsum('ckl,lab->ckab', wmat, shift_w)               # (2, k, W, W)
    # Stack avg-channel over max-channel along the contraction axis.
    col_cat = jnp.concatenate([col[0], col[1]], axis=1)            # (k, 2W, W)

    hr = jnp.arange(H)
    # R[kh][h, h'] = 1 iff h' == h + kh - pad; stack along columns -> (H, k*H)
    row_cat = jnp.concatenate(
        [(hr[None, :] == hr[:, None] + (kh - pad)).astype(jnp.float32)
         for kh in range(ksize)], axis=1)                          # (H, k*H)
    return col_cat.astype(dtype), row_cat.astype(dtype)


def _choose_c_tile(C, H, W, itemsize, tile_budget_bytes=8 * 1024 * 1024):
    """Largest divisor of C whose (c_tile, H, W) slab fits the tile budget."""
    max_cc = max(1, tile_budget_bytes // (H * W * itemsize))
    cc = min(C, max_cc)
    while C % cc:
        cc -= 1
    return cc


def spatial_attention_forward(x_nchw, conv_w, *, c_tile=None):
    """SpatialAttention forward.

    x_nchw: (N, C, H, W) float array (f32 or bf16).
    conv_w: (1, 2, k, k) PyTorch Conv2d weight, k in {3, 7}, no bias.
    Returns: (N, 1, H, W) sigmoid attention map, same dtype as x.
    """
    N, C, H, W = x_nchw.shape
    ksize = conv_w.shape[-1]
    assert conv_w.shape == (1, 2, ksize, ksize) and ksize in (3, 7)

    if c_tile is None:
        c_tile = _choose_c_tile(C, H, W, jnp.dtype(x_nchw.dtype).itemsize)
    assert C % c_tile == 0
    n_c = C // c_tile

    col_cat, row_cat = _build_shift_matrices(conv_w, H, W)

    kernel = functools.partial(_spatial_attention_kernel,
                               ksize=ksize, n_channels=C)

    # ~70% of physical VMEM, capped: plenty on v5e/v6e (128 MiB physical) while
    # leaving double-buffer / compiler-scratch headroom on v7x (64 MiB).
    try:
        vmem_limit = min(int(pltpu.get_tpu_info().vmem_capacity_bytes * 0.7),
                         96 * 1024 * 1024)
    except Exception:
        vmem_limit = 48 * 1024 * 1024

    return pl.pallas_call(
        kernel,
        out_shape=jax.ShapeDtypeStruct((N, 1, H, W), x_nchw.dtype),
        grid_spec=pltpu.PrefetchScalarGridSpec(
            num_scalar_prefetch=0,
            grid=(N, n_c),                       # channel tiles innermost
            in_specs=[
                # One (c_tile, H, W) channel slab per step, NCHW-native
                # (no wrapper transpose); W sits on the lane axis.
                pl.BlockSpec((None, c_tile, H, W), lambda n, c: (n, c, 0, 0)),
                # Grid-invariant weight matrices: constant index_map keeps them
                # resident; Buffered(1) drops the useless second buffer.
                pl.BlockSpec((ksize, 2 * W, W), lambda n, c: (0, 0, 0),
                             pipeline_mode=pl.Buffered(1)),
                pl.BlockSpec((H, ksize * H), lambda n, c: (0, 0),
                             pipeline_mode=pl.Buffered(1)),
            ],
            out_specs=pl.BlockSpec((None, None, H, W),
                                   lambda n, c: (n, 0, 0, 0)),
            scratch_shapes=[
                pltpu.VMEM((H, W), jnp.float32),   # running channel sum
                pltpu.VMEM((H, W), jnp.float32),   # running channel max
            ],
        ),
        compiler_params=pltpu.CompilerParams(
            # Batch shards across TensorCores (v7x megacore); channel tiles are
            # a sequential reduction.
            dimension_semantics=("parallel", "arbitrary"),
            vmem_limit_bytes=vmem_limit,
        ),
    )(x_nchw, col_cat, row_cat)


def reference_forward(x, conv_w):
    # Pure-JAX reference of the PyTorch module for sanity checking.
    avg = jnp.mean(x, axis=1, keepdims=True)
    mx = jnp.max(x, axis=1, keepdims=True)
    xc = jnp.concatenate([avg, mx], axis=1)                 # (N, 2, H, W)
    pad = conv_w.shape[-1] // 2
    y = jax.lax.conv_general_dilated(
        xc, conv_w.astype(xc.dtype), window_strides=(1, 1),
        padding=((pad, pad), (pad, pad)),
        dimension_numbers=('NCHW', 'OIHW', 'NCHW'),
        precision=jax.lax.Precision.HIGHEST)
    return jax.nn.sigmoid(y)


if __name__ == "__main__":
    key = jax.random.PRNGKey(0)
    k_x, k_w, k_x2, k_w2 = jax.random.split(key, 4)

    # Case 1: spec's small shape, kernel_size=3, single channel tile.
    N, C, H, W = 2, 4, 16, 16
    x = jax.random.normal(k_x, (N, C, H, W), dtype=jnp.float32)
    w3 = 0.5 * jax.random.normal(k_w, (1, 2, 3, 3), dtype=jnp.float32)

    out = jax.block_until_ready(spatial_attention_forward(x, w3))
    ref = reference_forward(x, w3)
    assert out.shape == (N, 1, H, W), out.shape
    err = float(jnp.max(jnp.abs(out - ref)))
    assert jnp.allclose(out, ref, atol=2e-2, rtol=2e-2), \
        f"k=3 mismatch vs reference, max abs err = {err}"

    # Case 2: kernel_size=7, forced c_tile=4 -> exercises the multi-step
    # channel accumulation path (grid axis 1 > 1) and N=1.
    N2, C2 = 1, 12
    x2 = jax.random.normal(k_x2, (N2, C2, H, W), dtype=jnp.float32)
    w7 = 0.25 * jax.random.normal(k_w2, (1, 2, 7, 7), dtype=jnp.float32)

    out2 = jax.block_until_ready(spatial_attention_forward(x2, w7, c_tile=4))
    ref2 = reference_forward(x2, w7)
    assert out2.shape == (N2, 1, H, W), out2.shape
    err2 = float(jnp.max(jnp.abs(out2 - ref2)))
    assert jnp.allclose(out2, ref2, atol=2e-2, rtol=2e-2), \
        f"k=7 mismatch vs reference, max abs err = {err2}"

    print("KERNEL_OK")
</pallas_src>

<mosaic_0001>
module attributes {stable_mosaic.version = 11 : i64} {
  func.func @_spatial_attention_kernel(%arg0: i32, %arg1: i32, %arg2: memref<1x4x16x16xf32, #tpu.memory_space<vmem>>, %arg3: memref<3x32x16xbf16, #tpu.memory_space<vmem>>, %arg4: memref<16x48xbf16, #tpu.memory_space<vmem>>, %arg5: memref<1x1x16x16xf32, #tpu.memory_space<vmem>>, %arg6: memref<16x16xf32, #tpu.memory_space<vmem>>, %arg7: memref<16x16xf32, #tpu.memory_space<vmem>>) attributes {dimension_semantics = [#tpu.dimension_semantics<parallel>, #tpu.dimension_semantics<arbitrary>], iteration_bounds = array<i64: 2, 1>, scalar_prefetch = 0 : i64, scratch_operands = 2 : i64, tpu.core_type = #tpu.core_type<tc>, window_params = [{transform_indices = @transform_0, window_bounds = array<i64: 1, 4, 16, 16>}, {pipeline_mode = #tpu.pipeline_mode<synchronous>, transform_indices = @transform_1, window_bounds = array<i64: 3, 32, 16>}, {pipeline_mode = #tpu.pipeline_mode<synchronous>, transform_indices = @transform_2, window_bounds = array<i64: 16, 48>}, {transform_indices = @transform_3, window_bounds = array<i64: 1, 1, 16, 16>}]} {
    %c0 = arith.constant 0 : index
    %c0_0 = arith.constant 0 : index
    %c0_1 = arith.constant 0 : index
    %c0_2 = arith.constant 0 : index
    %0 = vector.load %arg2[%c0, %c0_0, %c0_1, %c0_2] : memref<1x4x16x16xf32, #tpu.memory_space<vmem>>, vector<1x4x16x16xf32>
    %1 = vector.shape_cast %0 : vector<1x4x16x16xf32> to vector<4x16x16xf32>
    %cst = arith.constant dense<0xFF800000> : vector<16x16xf32>
    %2 = vector.multi_reduction <maximumf>, %1, %cst [0] : vector<4x16x16xf32> to vector<16x16xf32>
    %cst_3 = arith.constant dense<0.000000e+00> : vector<16x16xf32>
    %3 = vector.multi_reduction <add>, %1, %cst_3 [0] : vector<4x16x16xf32> to vector<16x16xf32>
    %c0_i32 = arith.constant 0 : i32
    %4 = arith.cmpi eq, %arg1, %c0_i32 : i32
    %5 = arith.extui %4 : i1 to i32
    %c0_i32_4 = arith.constant 0 : i32
    %6 = arith.cmpi ne, %5, %c0_i32_4 : i32
    scf.if %6 {
      %cst_15 = arith.constant 0.000000e+00 : f32
      %16 = vector.broadcast %cst_15 : f32 to vector<16x16xf32>
      %c0_16 = arith.constant 0 : index
      %c0_17 = arith.constant 0 : index
      %17 = vector.load %arg6[%c0_16, %c0_17] : memref<16x16xf32, #tpu.memory_space<vmem>>, vector<16x16xf32>
      tpu.vector_store %arg6[%c0_16, %c0_17], %16 {strides = array<i32>} : memref<16x16xf32, #tpu.memory_space<vmem>>, vector<16x16xf32>,
      %cst_18 = arith.constant 0xFF800000 : f32
      %18 = vector.broadcast %cst_18 : f32 to vector<16x16xf32>
      %c0_19 = arith.constant 0 : index
      %c0_20 = arith.constant 0 : index
      %19 = vector.load %arg7[%c0_19, %c0_20] : memref<16x16xf32, #tpu.memory_space<vmem>>, vector<16x16xf32>
      tpu.vector_store %arg7[%c0_19, %c0_20], %18 {strides = array<i32>} : memref<16x16xf32, #tpu.memory_space<vmem>>, vector<16x16xf32>,
    } else {
    }
    %c0_5 = arith.constant 0 : index
    %c0_6 = arith.constant 0 : index
    %7 = vector.load %arg6[%c0_5, %c0_6] : memref<16x16xf32, #tpu.memory_space<vmem>>, vector<16x16xf32>
    %8 = arith.addf %7, %3 : vector<16x16xf32>
    %c0_7 = arith.constant 0 : index
    %c0_8 = arith.constant 0 : index
    %9 = vector.load %arg6[%c0_7, %c0_8] : memref<16x16xf32, #tpu.memory_space<vmem>>, vector<16x16xf32>
    tpu.vector_store %arg6[%c0_7, %c0_8], %8 {strides = array<i32>} : memref<16x16xf32, #tpu.memory_space<vmem>>, vector<16x16xf32>,
    %c0_9 = arith.constant 0 : index
    %c0_10 = arith.constant 0 : index
    %10 = vector.load %arg7[%c0_9, %c0_10] : memref<16x16xf32, #tpu.memory_space<vmem>>, vector<16x16xf32>
    %11 = arith.maximumf %10, %2 : vector<16x16xf32>
    %c0_11 = arith.constant 0 : index
    %c0_12 = arith.constant 0 : index
    %12 = vector.load %arg7[%c0_11, %c0_12] : memref<16x16xf32, #tpu.memory_space<vmem>>, vector<16x16xf32>
    tpu.vector_store %arg7[%c0_11, %c0_12], %11 {strides = array<i32>} : memref<16x16xf32, #tpu.memory_space<vmem>>, vector<16x16xf32>,
    %c0_i32_13 = arith.constant 0 : i32
    %13 = arith.cmpi eq, %arg1, %c0_i32_13 : i32
    %14 = arith.extui %13 : i1 to i32
    %c0_i32_14 = arith.constant 0 : i32
    %15 = arith.cmpi ne, %14, %c0_i32_14 : i32
    scf.if %15 {
      %c0_15 = arith.constant 0 : index
      %c0_16 = arith.constant 0 : index
      %16 = vector.load %arg6[%c0_15, %c0_16] : memref<16x16xf32, #tpu.memory_space<vmem>>, vector<16x16xf32>
      %cst_17 = arith.constant 2.500000e-01 : f32
      %17 = vector.broadcast %cst_17 : f32 to vector<16x16xf32>
      %18 = arith.mulf %16, %17 : vector<16x16xf32>
      %c0_18 = arith.constant 0 : index
      %c0_19 = arith.constant 0 : index
      %19 = vector.load %arg7[%c0_18, %c0_19] : memref<16x16xf32, #tpu.memory_space<vmem>>, vector<16x16xf32>
      %20 = tpu.concatenate %18, %19 in 1 : vector<16x16xf32>, vector<16x16xf32> -> vector<16x32xf32>
      %21 = arith.truncf %20 : vector<16x32xf32> to vector<16x32xbf16>
      %c0_20 = arith.constant 0 : index
      %c0_21 = arith.constant 0 : index
      %c0_22 = arith.constant 0 : index
      %22 = vector.load %arg3[%c0_20, %c0_21, %c0_22] : memref<3x32x16xbf16, #tpu.memory_space<vmem>>, vector<1x32x16xbf16>
      %23 = vector.shape_cast %22 : vector<1x32x16xbf16> to vector<32x16xbf16>
      %cst_23 = arith.constant dense<0.000000e+00> : vector<16x16xf32>
      %24 = tpu.matmul %21, %23, %cst_23 {dimension_numbers = #tpu.dot_dimension_numbers<[1], [0], [0], [1], [0, 0, 1, 1], [], []>} : vector<16x32xbf16>, vector<32x16xbf16>, vector<16x16xf32> -> vector<16x16xf32>
      %c1 = arith.constant 1 : index
      %c0_24 = arith.constant 0 : index
      %c0_25 = arith.constant 0 : index
      %25 = vector.load %arg3[%c1, %c0_24, %c0_25] : memref<3x32x16xbf16, #tpu.memory_space<vmem>>, vector<1x32x16xbf16>
      %26 = vector.shape_cast %25 : vector<1x32x16xbf16> to vector<32x16xbf16>
      %cst_26 = arith.constant dense<0.000000e+00> : vector<16x16xf32>
      %27 = tpu.matmul %21, %26, %cst_26 {dimension_numbers = #tpu.dot_dimension_numbers<[1], [0], [0], [1], [0, 0, 1, 1], [], []>} : vector<16x32xbf16>, vector<32x16xbf16>, vector<16x16xf32> -> vector<16x16xf32>
      %c2 = arith.constant 2 : index
      %c0_27 = arith.constant 0 : index
      %c0_28 = arith.constant 0 : index
      %28 = vector.load %arg3[%c2, %c0_27, %c0_28] : memref<3x32x16xbf16, #tpu.memory_space<vmem>>, vector<1x32x16xbf16>
      %29 = vector.shape_cast %28 : vector<1x32x16xbf16> to vector<32x16xbf16>
      %cst_29 = arith.constant dense<0.000000e+00> : vector<16x16xf32>
      %30 = tpu.matmul %21, %29, %cst_29 {dimension_numbers = #tpu.dot_dimension_numbers<[1], [0], [0], [1], [0, 0, 1, 1], [], []>} : vector<16x32xbf16>, vector<32x16xbf16>, vector<16x16xf32> -> vector<16x16xf32>
      %31 = tpu.concatenate %24, %27, %30 in 0 : vector<16x16xf32>, vector<16x16xf32>, vector<16x16xf32> -> vector<48x16xf32>
      %32 = arith.truncf %31 : vector<48x16xf32> to vector<48x16xbf16>
      %c0_30 = arith.constant 0 : index
      %c0_31 = arith.constant 0 : index
      %33 = vector.load %arg4[%c0_30, %c0_31] : memref<16x48xbf16, #tpu.memory_space<vmem>>, vector<16x48xbf16>
      %cst_32 = arith.constant dense<0.000000e+00> : vector<16x16xf32>
      %34 = tpu.matmul %33, %32, %cst_32 {dimension_numbers = #tpu.dot_dimension_numbers<[1], [0], [0], [1], [0, 0, 1, 1], [], []>} : vector<16x48xbf16>, vector<48x16xbf16>, vector<16x16xf32> -> vector<16x16xf32>
      %cst_33 = arith.constant 0.000000e+00 : f32
      %35 = vector.broadcast %cst_33 : f32 to vector<16x16xf32>
      %36 = arith.cmpf oge, %34, %35 : vector<16x16xf32>
      %cst_34 = arith.constant 0.000000e+00 : f32
      %37 = vector.broadcast %cst_34 : f32 to vector<16x16xf32>
      %38 = arith.subf %37, %34 : vector<16x16xf32>
      %39 = arith.select %36, %38, %34 : vector<16x16xi1>, vector<16x16xf32>
      %40 = math.exp %39 : vector<16x16xf32>
      %cst_35 = arith.constant 1.000000e+00 : f32
      %41 = vector.broadcast %cst_35 : f32 to vector<16x16xf32>
      %42 = arith.addf %41, %40 : vector<16x16xf32>
      %43 = tpu.reciprocal %42 {approx = true} : vector<16x16xf32> -> vector<16x16xf32>
      %44 = arith.mulf %40, %43 : vector<16x16xf32>
      %45 = arith.select %36, %43, %44 : vector<16x16xi1>, vector<16x16xf32>
      %c0_36 = arith.constant 0 : index
      %c0_37 = arith.constant 0 : index
      %c0_38 = arith.constant 0 : index
      %c0_39 = arith.constant 0 : index
      %46 = vector.load %arg5[%c0_36, %c0_37, %c0_38, %c0_39] : memref<1x1x16x16xf32, #tpu.memory_space<vmem>>, vector<1x1x16x16xf32>
      %47 = vector.shape_cast %46 : vector<1x1x16x16xf32> to vector<16x16xf32>
      %48 = vector.shape_cast %45 : vector<16x16xf32> to vector<1x1x16x16xf32>
      tpu.vector_store %arg5[%c0_36, %c0_37, %c0_38, %c0_39], %48 {strides = array<i32>} : memref<1x1x16x16xf32, #tpu.memory_space<vmem>>, vector<1x1x16x16xf32>,
    } else {
    }
    return
  }
  func.func @transform_0(%arg0: i32, %arg1: i32) -> (i32, i32, i32, i32) {
    %c0_i32 = arith.constant 0 : i32
    %c0_i32_0 = arith.constant 0 : i32
    %c0_i32_1 = arith.constant 0 : i32
    return %arg0, %arg1, %c0_i32, %c0_i32_0 : i32, i32, i32, i32
  }
  func.func @transform_1(%arg0: i32, %arg1: i32) -> (i32, i32, i32) {
    %c0_i32 = arith.constant 0 : i32
    %c0_i32_0 = arith.constant 0 : i32
    %c0_i32_1 = arith.constant 0 : i32
    %c0_i32_2 = arith.constant 0 : i32
    return %c0_i32, %c0_i32_0, %c0_i32_1 : i32, i32, i32
  }
  func.func @transform_2(%arg0: i32, %arg1: i32) -> (i32, i32) {
    %c0_i32 = arith.constant 0 : i32
    %c0_i32_0 = arith.constant 0 : i32
    %c0_i32_1 = arith.constant 0 : i32
    return %c0_i32, %c0_i32_0 : i32, i32
  }
  func.func @transform_3(%arg0: i32, %arg1: i32) -> (i32, i32, i32, i32) {
    %c0_i32 = arith.constant 0 : i32
    %c0_i32_0 = arith.constant 0 : i32
    %c0_i32_1 = arith.constant 0 : i32
    %c0_i32_2 = arith.constant 0 : i32
    return %arg0, %c0_i32, %c0_i32_0, %c0_i32_1 : i32, i32, i32, i32
  }
}

</mosaic_0001>

<bundles_post_ra>
// kernel: tpu_custom_call.1
= control target key start
LH: loop header
LB: loop body
LE: loop exit
PB: predicated region body
PF: predicated region fallthrough
CT: control target
= control target key end

     0   :  { %8 = vsyncpa [#allocation5], 0  ;;  %s1200_s0 = inlined_call_operand.hbm [shape: f32[2,4,16,16], index: 0, kind: input, shape index: {}]   ;;  %s1201_s1 = inlined_call_operand.vmem [shape: bf16[3,32,16], index: 1, kind: input, shape index: {}]   ;;  %s1202_s2 = inlined_call_operand.vmem [shape: bf16[16,48], index: 2, kind: input, shape index: {}]   ;;  %s1203_s3 = inlined_call_operand.hbm [shape: f32[2,1,16,16], index: 3, kind: output, shape index: {}]  }
   0x1   :  { %10 = vsyncpa [#allocation5 + $0x1], 0 }
   0x2   :  { %11 = vsyncpa [#allocation6], 0 }
   0x3   :  { %13 = vsyncpa [#allocation6 + $0x1], 0  ;;  %s952_s12 = smov 0   ;;  %s954_s13 = smov 0  }
   0x4   :  { %s956_s14 = smov 0   ;;  %s958_s15 = smov 0  }
   0x5   :  { %s960_s16 = smov 0   ;;  %s962_s17 = smov 0  }
   0x6 LB: > { %s635_s18 = sadd.s32 4294967295, %s920_s17   ;;  %s636_s19 = sadd.s32 4294967294, %s920_s17   ;;  %s920_s17 = sphi %s962_s17, %s19_s17   ;;  %s916_s16 = sphi %s960_s16, %s1218_s16   ;;  %s912_s15 = sphi %s958_s15, %s1217_s15   ;;  %s908_s14 = sphi %s956_s14, %s1216_s14   ;;  %s904_s13 = sphi %s954_s13, %s1215_s13   ;;  %s900_s12 = sphi %s952_s12, %s1214_s12  }
   0x7   : > { %s31_s20 = sadd.s32 1, %s916_s16  ;;  %s40_s21 = sadd.s32 1, %s908_s14 }
   0x8   : > { %p33_p0 = scmp.ge.s32.totalorder %s31_s20, 2  ;;  %p47_p1 = scmp.ne.s32.totalorder %s908_s14, %s904_s13 }
   0x9   : > { %p48_p2 = scmp.eq.s32.totalorder %s920_s17, 0  ;;  %p53_p3 = scmp.ne.s32.totalorder %s904_s13, %s900_s12 }
   0xa   : > { %s1220_s20 = smov (%p33_p0, %s31_s20), 0  ;;  %p54_p5 = scmp.eq.s32.totalorder %s635_s18, 0 }
   0xb   : > { %p993_p4 = por %p48_p2, %p47_p1  ;;  %s35_s23 = ssub.s32 %s916_s16, %s1220_s20 }
   0xc   : > { %p119_p6 = scmp.eq.s32.totalorder %s635_s18, 1  ;;  %p38_p7 = scmp.eq.s32.totalorder %s35_s23, 0 }
   0xd   : > { %p999_p8 = por %p54_p5, %p53_p3  ;;  %p125_p10 = scmp.eq.s32.totalorder %s636_s19, 1 }
   0xe   : > { %p1003_p9 = por %p119_p6, %p47_p1  ;;  %p730_p13 = scmp.lt.s32.totalorder %s920_s17, 2 }
   0xf   : > { %s1008_s26 = scalar_select %p38_p7, %s908_s14, %s40_s21  }
  0x10   : > { %s1207_s25 = scalar_select %p1003_p9, 1, 0 }
  0x11   : > { %p1010_p11 = por %p125_p10, %p53_p3  ;;  %s151_s28 = sand.u32 1, %s908_s14  }
  0x12   : > { %s639_s29 = sshll.u32 %s151_s28, 6  ;;  %s669_s30 = sshll.u32 %s916_s16, 10 }
  0x13   : > { %s1208_s27 = scalar_select %p1010_p11, 1, 0 }
  0x14   : > { %s1021_s6 = scalar_lea.hbm %s1200_s0, %s669_s30  ;;  %s155_s7 = scalar_lea.vmem [#allocation4], %s639_s29 }
  0x15   : > { %s165_s8 = sshll.u32 %s155_s7, 4  ;;  %p1027_p0 = pnand %p730_p13, %p993_p4  ;;  %s1023_s8 = int_to_ptr.vmem [resolvable:$true] %s165_s8 }
  0x16   : > { %s1032_s10 = scalar_lea.sflag [#allocation5], %s151_s28  ;;  %s808_s11 = scalar_lea.hbm %s1021_s6, 1024 }
  0x17   : > { %p809_p2 = scmp.ne.s32.totalorder %s1021_s6, %s808_s11  ;;  %p810_p3 = pneg %p1027_p0 }
  0x18   : > { %s813_s21 = scalar_lea.hbm %s1200_s0, 2048  ;;  %p814_p4 = scmp.lt.u32.totalorder %s1021_s6, %s1200_s0 }
  0x19   : > { %p811_p5 = pnand %p810_p3, %p809_p2  ;;  %p815_p7 = scmp.lt.u32.totalorder %s813_s21, %s808_s11 }
  0x1a   : > { %p817_p13 = scmp.lt.u32.totalorder %s808_s11, %s1021_s6 }
  0x1b   : > { %p812_p6 = pneg %p811_p5  ;;  %p816_p10 = por %p815_p7, %p814_p4 }
  0x1d   : > { %p818_p12 = por %p817_p13, %p816_p10 }
  0x1f   : > { %p819_p1 = pnand %p818_p12, %p812_p6 }
  0x21   : > { %822 = shalt.err (!%p819_p1)
}
  0x22   : > { %s823_s28 = scalar_lea.vmem %s1023_s8, 1024  ;;  %s922_s29 = smov [#allocation4]  }
  0x23   : > { %p824_p2 = scmp.ne.s32.totalorder %s1023_s8, %s823_s28  ;;  %s828_s30 = sshll.u32 %s922_s29, 4  ;;  %s829_s30 = int_to_ptr.vmem [resolvable:$false] %s828_s30 }
  0x24   : > { %s830_s4 = scalar_lea.vmem %s829_s30, 2048  ;;  %p831_p9 = scmp.lt.s32.totalorder %s1023_s8, %s829_s30 }
  0x25   : > { %p826_p5 = pnand %p824_p2, %p810_p3  ;;  %p832_p4 = scmp.lt.s32.totalorder %s830_s4, %s823_s28 }
  0x27   : > { %p827_p11 = pneg %p826_p5  ;;  %p833_p7 = por %p832_p4, %p831_p9 }
  0x29   : > { %p834_p10 = pnand %p833_p7, %p827_p11 }
  0x2b   : > { %837 = shalt.err (!%p834_p10)
}
  0x2c   : > { %s923_s5 = smov 128   ;;  %s924_s7 = smov 8  }
  0x2d   : > { %725 = dma.hbm_to_vmem [thread:$0]  (!%p1027_p0), %s1021_s6, 1024, %s1023_s8, %s1032_s10, %s923_s5, %s923_s5, %s924_s7  }
  0x2e   : > { %p173_p12 = scmp.lt.s32.totalorder %s920_s17, 3  ;;  %p1210_p1 = scmp.ge.s32.totalorder %s920_s17, 1 }
  0x30   : > { %p174_p3 = pnand %p1210_p1, %p173_p12 }
  0x31   : > { %s1064_s11 = sand.u32 (!%p174_p3), 1, %s904_s13  }
  0x32   : > { %177 = sbr.rel (%p174_p3) target bundleno = 687 (0x2af), region = 32  ;;  %s643_s18 = sshll.u32 (!%p174_p3), %s1064_s11, 6 }
  0x33   : > { %s180_s19 = scalar_lea.sflag (!%p174_p3), [#allocation5], %s1064_s11  ;;  %s183_s21 = scalar_lea.vmem (!%p174_p3), [#allocation4], %s643_s18 }
  0x39   : > { %891 = dma.done.wait (%p999_p8), %s180_s19, 1024  }
  0x3a   : > { %893 = vsyncadd (%p999_p8), %s180_s19, 4294966272  ;;  %vm216_vm0 = vcmask 130048   ;;  %v925_v0 = vmov -inf   ;;  %v926_v1 = vmov 0.0   ;;  %v208_v2 = vld [vmem:[%s183_s21] sm:$0xff]  ;;  %v209_v3 = vld [vmem:[%s183_s21 + $0x8] sm:$0xff] }
  0x3b   : > { %251 = vst.msk [vmem:[#allocation3] sm:$0xff] %vm216_vm0, %v925_v0  ;;  %252 = vst.msk [vmem:[#allocation3 + $0x8] sm:$0xff] %vm216_vm0, %v925_v0  ;;  %684 = vmatprep.subr.bf16.mxu0 %v926_v1  ;;  %692 = vmatprep.subr.bf16.mxu1 %v926_v1  ;;  %v210_v4 = vld [vmem:[%s183_s21 + $0x10] sm:$0xff]  ;;  %v211_v5 = vld [vmem:[%s183_s21 + $0x18] sm:$0xff]  ;;  %v217_v8 = vsel %vm216_vm0, %v208_v2, -inf  ;;  %v224_v10 = vsel %vm216_vm0, %v209_v3, -inf }
  0x3c   : > { %249 = vst.msk [vmem:[#allocation2] sm:$0xff] %vm216_vm0, %v926_v1  ;;  %250 = vst.msk [vmem:[#allocation2 + $0x8] sm:$0xff] %vm216_vm0, %v926_v1  ;;  %v212_v6 = vld [vmem:[%s183_s21 + $0x20] sm:$0xff]  ;;  %v213_v7 = vld [vmem:[%s183_s21 + $0x28] sm:$0xff]  ;;  %v218_v9 = vsel %vm216_vm0, %v210_v4, -inf  ;;  %v225_v14 = vsel %vm216_vm0, %v211_v5, -inf }
  0x3d   : > { %v214_v11 = vld [vmem:[%s183_s21 + $0x30] sm:$0xff]  ;;  %v215_v12 = vld [vmem:[%s183_s21 + $0x38] sm:$0xff]  ;;  %v219_v13 = vsel %vm216_vm0, %v212_v6, -inf  ;;  %v226_v15 = vsel %vm216_vm0, %v213_v7, -inf  ;;  %v231_v16 = vsel %vm216_vm0, %v208_v2, 0.0  ;;  %v232_v24 = vsel %vm216_vm0, %v210_v4, 0.0 }
  0x3e   : > { %v220_v17 = vmax.f32 %v217_v8, %v219_v13  ;;  %v221_v18 = vsel %vm216_vm0, %v214_v11, -inf  ;;  %v227_v19 = vmax.f32 %v224_v10, %v226_v15  ;;  %v228_v20 = vsel %vm216_vm0, %v215_v12, -inf  ;;  %v793_v26 = vld [vmem:[%s1201_s1] sm:$0xff]   ;;  %v794_v27 = vld [vmem:[%s1201_s1 + $0x10] sm:$0xff]   ;;  %v795_v41 = vld [vmem:[%s1201_s1 + $0x8] sm:$0xff]   ;;  %s928_s29 = smov 16  }
  0x3f   : > { %v222_v22 = vmax.f32 %v218_v9, %v221_v18  ;;  %v229_v23 = vmax.f32 %v225_v14, %v228_v20  ;;  %v234_v25 = vsel %vm216_vm0, %v212_v6, 0.0  ;;  %v233_v28 = vadd.f32 %v232_v24, %v231_v16  ;;  %685 = vmatpush3.bf16.msra.mxu0 %v793_v26  ;;  %693 = vmatpush3.bf16.msra.mxu1 %v794_v27  ;;  %v796_v45 = vld [vmem:[%s1201_s1 + $0x18] sm:$0xff]   ;;  %v797_v62 = vld [vmem:[%s1201_s1 + $0x20] sm:$0xff]   ;;  %v798_v0 = vld [vmem:[%s1201_s1 + $0x28] sm:$0xff]   ;;  %s644_s21 = sshll.u32 %s1064_s11, 4  ;;  %s670_s24 = sshll.u32 %s912_s15, 8 }
  0x40   : > { %v236_v29 = vsel %vm216_vm0, %v214_v11, 0.0  ;;  %v238_v30 = vsel %vm216_vm0, %v209_v3, 0.0  ;;  %v239_v31 = vsel %vm216_vm0, %v211_v5, 0.0  ;;  %v241_v36 = vsel %vm216_vm0, %v213_v7, 0.0  ;;  %686 = vmatprep.subr.bf16.mxu0 %v926_v1  ;;  %694 = vmatprep.subr.bf16.mxu1 %v926_v1  ;;  %s205_s6 = scalar_lea.vmem [#allocation7], %s644_s21  ;;  %s1146_s22 = scalar_lea.hbm %s1203_s3, %s670_s24 }
  0x41   : > { %v223_v33 = vmax.f32 %v220_v17, %v222_v22  ;;  %v230_v34 = vmax.f32 %v227_v19, %v229_v23  ;;  %v240_v35 = vadd.f32 %v239_v31, %v238_v30  ;;  %v235_v38 = vadd.f32 %v234_v25, %v233_v28  ;;  %v799_v17 = vld [vmem:[%s1202_s2] sm:$0xff]   ;;  %s551_s8 = sshll.u32 %s205_s6, 4  ;;  %s538_s15 = scalar_lea.sflag [#allocation6], %s1064_s11  ;;  %s1148_s8 = int_to_ptr.vmem [resolvable:$true] %s551_s8 }
  0x42   : > { %v259_v21 = vld [vmem:[#allocation3] sm:$0xff]  ;;  %v260_v32 = vld [vmem:[#allocation3 + $0x8] sm:$0xff]  ;;  %v243_v39 = vsel %vm216_vm0, %v215_v12, 0.0  ;;  %vm927_vm1 = vmmov 0   ;;  %vm301_vm2 = vcmask 261120   ;;  %vm472_vm3 = vcmask 392192  }
  0x43   : > { %v253_v37 = vld [vmem:[#allocation2] sm:$0xff]  ;;  %v254_v40 = vld [vmem:[#allocation2 + $0x8] sm:$0xff]  ;;  %v242_v42 = vadd.f32 %v241_v36, %v240_v35  ;;  %v261_v43 = vmax.f32 %v259_v21, %v223_v33  ;;  %v262_v44 = vmax.f32 %v260_v32, %v230_v34  ;;  %v237_v46 = vadd.f32 %v236_v29, %v235_v38  ;;  %687 = vmatpush3.bf16.msra.mxu0 %v795_v41  ;;  %s838_s23 = scalar_lea.vmem %s1148_s8, 256  ;;  %p1211_p9 = scmp.ne.s32.totalorder %s1207_s25, 0 }
  0x44   : > { %695 = vmatpush3.bf16.msra.mxu1 %v796_v45  ;;  %688 = vmatprep.mubr.msk.bf16.mxu0 %vm927_vm1, %v926_v1  ;;  %p839_p8 = scmp.ne.s32.totalorder %s1148_s8, %s838_s23  ;;  %s929_s28 = smov [#allocation7]  }
  0x45   : > { %v244_v47 = vadd.f32 %v243_v39, %v242_v42  ;;  %263 = vst.msk [vmem:[#allocation3] sm:$0xff] %vm216_vm0, %v261_v43  ;;  %264 = vst.msk [vmem:[#allocation3 + $0x8] sm:$0xff] %vm216_vm0, %v262_v44  ;;  %v255_v48 = vadd.f32 %v253_v37, %v237_v46  ;;  %696 = vmatprep.mubr.msk.bf16.mxu1 %vm927_vm1, %v926_v1  ;;  %700 = vmatprep.subr.bf16.mxu0 %v926_v1 }
  0x46   : > { %708 = vmatprep.subr.bf16.mxu1 %v926_v1  ;;  %p840_p11 = pnand %p839_p8, %p1211_p9 }
  0x47   : > { %v256_v49 = vadd.f32 %v254_v40, %v244_v47  ;;  %257 = vst.msk [vmem:[#allocation2] sm:$0xff] %vm216_vm0, %v255_v48 }
  0x48   : > { %p841_p0 = pneg %p840_p11 }
  0x49   : > { %258 = vst.msk [vmem:[#allocation2 + $0x8] sm:$0xff] %vm216_vm0, %v256_v49 }
  0x4c   : > { %v272_v50 = vld [vmem:[#allocation3] sm:$0xff]  ;;  %v273_v51 = vld [vmem:[#allocation3 + $0x8] sm:$0xff] }
  0x4d   : > { %v788_v52 = vpack.i.bf16 %v273_v51, %v272_v50 }
  0x4e   : > { %v268_v53 = vld [vmem:[#allocation2] sm:$0xff] }
  0x4f   : > { %789 = vrot.lane.b32.xlu0 %v788_v52, %s928_s29  ;;  %v270_v55 = vmul.f32 0.25, %v268_v53  ;;  %s842_s29 = sshll.u32 %s929_s28, 4  ;;  %s843_s29 = int_to_ptr.vmem [resolvable:$false] %s842_s29 }
  0x50   : > { %v269_v54 = vld [vmem:[#allocation2 + $0x8] sm:$0xff]  ;;  %s844_s30 = scalar_lea.vmem %s843_s29, 512  ;;  %p845_p6 = scmp.lt.s32.totalorder %s1148_s8, %s843_s29 }
  0x51   : > { %v271_v56 = vmul.f32 0.25, %v269_v54  ;;  %p846_p13 = scmp.lt.s32.totalorder %s844_s30, %s838_s23 }
  0x53   : > { %p847_p2 = por %p846_p13, %p845_p6 }
  0x55   : > { %p848_p5 = pnand %p847_p2, %p841_p0 }
  0xc1   : > { %v790_v57 = vpop.permute.xlu0 %789 }
  0xc2   : > { %v792_v58 = vunpack.i.h.bf16 %v790_v57  ;;  %v791_v59 = vunpack.i.l.bf16 %v790_v57 }
  0xc4   : > { %v283_v60 = vsel %vm216_vm0, %v271_v56, %v792_v58  ;;  %v282_v61 = vsel %vm216_vm0, %v270_v55, %v791_v59 }
  0xc5   : > { %v284_v63 = vpack.c.bf16 %v283_v60, %v282_v61 }
  0xc7   : > { %689 = vmatmul.mubr.msk.bf16.vlgmr.msra.gmra.mrb[0].mxu0 %vm301_vm2, %v284_v63  ;;  %697 = vmatmul.mubr.msk.bf16.vlgmr.msra.gmra.mrb[0].mxu1 %vm301_vm2, %v284_v63 }
  0xc8   : > { %701 = vmatpush3.bf16.msra.mxu0 %v797_v62  ;;  %704 = vmatprep.mubr.msk.bf16.mxu0 %vm927_vm1, %v926_v1 }
  0xc9   : > { %702 = vmatprep.subr.bf16.mxu0 %v926_v1  ;;  %714 = vmatprep.mubr.msk.bf16.mxu1 %vm927_vm1, %v926_v1 }
  0xcc   : > { %703 = vmatpush3.bf16.msra.mxu0 %v798_v0 }
  0xcf   : > { %705 = vmatmul.mubr.msk.bf16.vlgmr.msra.gmra.mrb[4].mxu0 %vm301_vm2, %v284_v63 }
 0x19a   : > { %v339_v2 = vpop.f32.mrb[0].mxu0  ;;  %v397_v3 = vpop.f32.mrb[0].mxu1 }
 0x19b   : > { %v690_v4 = vpop.f32.mrb[1].mxu0  ;;  %v698_v5 = vpop.f32.mrb[1].mxu1 }
 0x19c   : > { %v342_v6 = vpop.f32.mrb[2].mxu0  ;;  %v400_v7 = vpop.f32.mrb[2].mxu1 }
 0x19d   : > { %v462_v8 = vpack.c.bf16 %v342_v6, %v339_v2  ;;  %v463_v9 = vpack.c.bf16 %v400_v7, %v397_v3  ;;  %v691_v10 = vpop.f32.mrb[3].mxu0  ;;  %v699_v11 = vpop.f32.mrb[3].mxu1 }
 0x19f   : > { %709 = vmatpush3.bf16.msra.mxu1 %v462_v8 }
 0x1a0   : > { %710 = vmatprep.subr.bf16.mxu1 %v926_v1 }
 0x1a2   : > { %v455_v12 = vpop.f32.mrb[4].mxu0 }
 0x1a3   : > { %v706_v13 = vpop.f32.mrb[5].mxu0  ;;  %711 = vmatpush3.bf16.msra.mxu1 %v463_v9 }
 0x1a4   : > { %v458_v14 = vpop.f32.mrb[6].mxu0  ;;  %712 = vmatprep.subr.bf16.mxu1 %v926_v1 }
 0x1a5   : > { %v464_v15 = vpack.c.bf16 %v458_v14, %v455_v12  ;;  %v707_v16 = vpop.f32.mrb[7].mxu0 }
 0x1a7   : > { %713 = vmatpush3.bf16.msra.mxu1 %v464_v15 }
 0x1aa   : > { %715 = vmatmul.mubr.msk.bf16.vlgmr.msra.gmra.mrb[4].mxu1 %vm472_vm3, %v799_v17 }
 0x27d   : > { %v510_v18 = vpop.f32.mrb[4].mxu1 }
 0x27e   : > { %vm517_vm4 = vcmp.ge.f32.partialorder %v510_v18, 0.0  ;;  %v519_v19 = vsub.f32 0.0, %v510_v18  ;;  %v716_v20 = vpop.f32.mrb[5].mxu1 }
 0x27f   : > { %v513_v21 = vpop.f32.mrb[6].mxu1 }
 0x280   : > { %v521_v22 = vsel %vm517_vm4, %v519_v19, %v510_v18  ;;  %vm518_vm5 = vcmp.ge.f32.partialorder %v513_v21, 0.0  ;;  %v520_v1 = vsub.f32 0.0, %v513_v21  ;;  %v717_v23 = vpop.f32.mrb[7].mxu1 }
 0x281   : > { %v523_v24 = vmul.f32 1.442695, %v521_v22 }
 0x282   : > { %v522_v25 = vsel %vm518_vm5, %v520_v1, %v513_v21 }
 0x283   : > { %800 = vpow2.f32 %v523_v24  ;;  %v525_v26 = vmul.f32 1.442695, %v522_v25 }
 0x285   : > { %802 = vpow2.f32 %v525_v26 }
 0x28d   : > { %v801_v27 = vpop.eup %800 }
 0x28e   : > { %v527_v28 = vadd.f32 1.0, %v801_v27 }
 0x28f   : > { %v803_v29 = vpop.eup %802 }
 0x290   : > { %804 = vrcp.f32 %v527_v28  ;;  %v528_v30 = vadd.f32 1.0, %v803_v29 }
 0x292   : > { %806 = vrcp.f32 %v528_v30 }
 0x29a   : > { %v805_v31 = vpop.eup %804 }
 0x29b   : > { %v531_v32 = vmul.f32 %v805_v31, %v801_v27 }
 0x29c   : > { %v807_v33 = vpop.eup %806 }
 0x29d   : > { %v533_v34 = vsel %vm517_vm4, %v805_v31, %v531_v32  ;;  %v532_v35 = vmul.f32 %v807_v33, %v803_v29 }
 0x29e   : > { %535 = vst.msk [vmem:[%s205_s6] sm:$0xff] %vm216_vm0, %v533_v34 }
 0x29f   : > { %v534_v36 = vsel %vm518_vm5, %v807_v33, %v532_v35 }
 0x2a0   : > { %536 = vst.msk [vmem:[%s205_s6 + $0x8] sm:$0xff] %vm216_vm0, %v534_v36 }
 0x2a1   : > { %851 = shalt.err (!%p848_p5)
}
 0x2a2   : > { %s852_s4 = scalar_lea.hbm %s1146_s22, 256  ;;  %s856_s18 = scalar_lea.hbm %s1203_s3, 512 }
 0x2a3   : > { %p853_p4 = scmp.ne.s32.totalorder %s1146_s22, %s852_s4  ;;  %p857_p12 = scmp.lt.u32.totalorder %s1146_s22, %s1203_s3 }
 0x2a4   : > { %p858_p1 = scmp.lt.u32.totalorder %s856_s18, %s852_s4  ;;  %p860_p8 = scmp.lt.u32.totalorder %s852_s4, %s1146_s22 }
 0x2a5   : > { %p854_p7 = pnand %p853_p4, %p1211_p9 }
 0x2a6   : > { %p859_p3 = por %p858_p1, %p857_p12 }
 0x2a7   : > { %p855_p10 = pneg %p854_p7 }
 0x2a8   : > { %p861_p11 = por %p860_p8, %p859_p3 }
 0x2aa   : > { %p862_p0 = pnand %p861_p11, %p855_p10 }
 0x2ac   : > { %865 = shalt.err (!%p862_p0)
}
 0x2ad   : > { %s930_s24 = smov 128   ;;  %s931_s6 = smov 8  }
 0x2ae   : > { %720 = dma.vmem_to_hbm [thread:$0]  (%p1211_p9), %s1148_s8, 256, %s1146_s22, %s538_s15, %s930_s24, %s930_s24, %s931_s6  }
 0x2af PF: > { %s566_s9 = sand.u32 1, %s900_s12   ;;  %p1212_p6 = scmp.ne.s32.totalorder %s1208_s27, 0 }
 0x2b0   : > { %p1213_p13 = scmp.ge.s32.totalorder %s920_s17, 2  ;;  %s567_s10 = scalar_lea.sflag [#allocation6], %s566_s9 }
 0x2b2   : > { %p727_p2 = pnand %p1213_p13, %p1212_p6 }
 0x2b4   : > { %895 = dma.done.wait (!%p727_p2), %s567_s10, 256  }
 0x2b5   : > { %897 = vsyncadd (!%p727_p2), %s567_s10, 4294967040  ;;  %s19_s17 = sadd.s32 1, %s920_s17   ;;  %s1214_s12 = smov %s904_s13 }
 0x2b6   : > { %p16_p5 = scmp.ge.s32.totalorder %s19_s17, 4   ;;  %s1215_s13 = smov %s908_s14 }
 0x2b7   : > { %s1216_s14 = smov %s1008_s26  ;;  %s1217_s15 = smov %s916_s16 }
 0x2b8   : > { %s1218_s16 = smov %s1220_s20  ;;  %18 = sbr.rel (!%p16_p5) target bundleno = 6 (0x6), region = 87 }
 0x2bf   :  { %572 = vsyncpa [#allocation5], 1 }
 0x2c0   :  { %574 = vsyncpa [#allocation5 + $0x1], 1 }
 0x2c1   :  { %575 = vsyncpa [#allocation6], 1 }
 0x2c2   :  { %577 = vsyncpa [#allocation6 + $0x1], 1 }

</bundles_post_ra>
